<compile_context>
chip_gen: v7x
topology: tpu7x:2x2x1
jax: 0.10.0
libtpu: 0.0.40
codegen_flags: <defaults>
</compile_context>

<pallas_src>
import functools

import jax
import jax.numpy as jnp
import numpy as np
from jax.experimental import pallas as pl
from jax.experimental.pallas import tpu as pltpu

LANE = 128


def _fused_gcn_kernel(a_ref, x_ref, *refs, layer_dims):
    """All GCN layers fused: h_{i+1} = relu(Â h_i W_i + b_i); last layer no ReLU.

    refs = (w_0, b_0, ..., w_{L-1}, b_{L-1}, o_ref).  Â/X/W are bf16, biases f32.
    """
    o_ref = refs[-1]
    wb_refs = refs[:-1]
    num_layers = len(wb_refs) // 2

    a = a_ref[...]                      # (N, N) bf16, loaded once, reused L times
    h = x_ref[...]                      # (N, C_in) bf16

    for i in range(num_layers):         # static unroll over the L layers
        w = wb_refs[2 * i][...]         # (C_in, C_out[_padded]) bf16
        b = wb_refs[2 * i + 1][...]     # (1,   C_out[_padded]) f32
        c_in, c_out = layer_dims[i]     # logical (unpadded) dims

        if c_in <= c_out:
            # (Â @ H) @ W — smaller inner product first (e.g. first layer 8->32).
            ah = jnp.dot(a, h, preferred_element_type=jnp.float32)
            out = jnp.dot(ah.astype(jnp.bfloat16), w,
                          preferred_element_type=jnp.float32)
        else:
            # Â @ (H @ W) — shrink channels before the N×N aggregation.
            hw = jnp.dot(h, w, preferred_element_type=jnp.float32)
            out = jnp.dot(a, hw.astype(jnp.bfloat16),
                          preferred_element_type=jnp.float32)

        out = out + b                   # f32 bias add

        if i < num_layers - 1:
            out = jnp.maximum(out, 0.0)         # ReLU in f32 (VPU)
            h = out.astype(jnp.bfloat16)        # back to bf16 for the next MXU dot
        else:
            o_ref[...] = out.astype(o_ref.dtype)  # lane-dense (N, 128) f32 store


def normalized_adjacency(edge_index, num_nodes):
    """Dense Â = D̂^{-1/2} (A + I) D̂^{-1/2}, matching PyG GCNConv normalization."""
    src = edge_index[0]
    dst = edge_index[1]
    a = jnp.zeros((num_nodes, num_nodes), jnp.float32)
    # message flows source -> target: A[target, source] += 1 (scatter_add semantics)
    a = a.at[dst, src].add(1.0)
    a = a + jnp.eye(num_nodes, dtype=jnp.float32)  # self loops
    deg = a.sum(axis=1)                            # in-degree incl. self loop
    dinv_sqrt = jnp.where(deg > 0.0, 1.0 / jnp.sqrt(deg), 0.0)
    return dinv_sqrt[:, None] * a * dinv_sqrt[None, :]


def init_params(key, d_in, hidden, num_layers):
    """Deterministic glorot-ish weights, zero biases; shapes as in MultiLayerGCNNet."""
    dims = [d_in] + [hidden] * (num_layers - 1) + [1]
    params = []
    for i in range(num_layers):
        key, sub = jax.random.split(key)
        fan_in, fan_out = dims[i], dims[i + 1]
        scale = jnp.sqrt(6.0 / (fan_in + fan_out))
        w = jax.random.uniform(sub, (fan_in, fan_out), jnp.float32, -scale, scale)
        b = jnp.zeros((1, fan_out), jnp.float32)
        params.append((w, b))
    return params


def multilayer_gcn_forward(x, edge_index, params):
    """One fused pallas_call for the whole network."""
    n = x.shape[0]
    num_layers = len(params)
    layer_dims = tuple((int(w.shape[0]), int(w.shape[1])) for w, _ in params)

    a_hat = normalized_adjacency(edge_index, n).astype(jnp.bfloat16)
    x_bf = x.astype(jnp.bfloat16)

    # Pad the last layer's (H, 1) weight / (1, 1) bias to 128 output lanes so the
    # final store is lane-dense; slice column 0 back out below.
    c_out_last = layer_dims[-1][1]
    pad = LANE - c_out_last
    flat_inputs = [a_hat, x_bf]
    for i, (w, b) in enumerate(params):
        if i == num_layers - 1:
            w = jnp.pad(w, ((0, 0), (0, pad)))
            b = jnp.pad(b, ((0, 0), (0, pad)))
        flat_inputs.append(w.astype(jnp.bfloat16))
        flat_inputs.append(b.astype(jnp.float32))

    kern = functools.partial(_fused_gcn_kernel, layer_dims=layer_dims)
    out_padded = pl.pallas_call(
        kern,
        out_shape=jax.ShapeDtypeStruct((n, LANE), jnp.float32),
        in_specs=[pl.BlockSpec(memory_space=pltpu.MemorySpace.VMEM)]
        * len(flat_inputs),
        out_specs=pl.BlockSpec(memory_space=pltpu.MemorySpace.VMEM),
    )(*flat_inputs)
    return out_padded[:, :c_out_last]


def multilayer_gcn_reference(x, edge_index, params):
    """Pure-JAX f32 reference (matches the PyTorch module)."""
    a_hat = normalized_adjacency(edge_index, x.shape[0])
    h = x
    num_layers = len(params)
    for i, (w, b) in enumerate(params):
        h = a_hat @ (h @ w) + b
        if i < num_layers - 1:
            h = jnp.maximum(h, 0.0)
    return h


if __name__ == "__main__":
    # Small shapes consistent with the module: L=3 GCN layers, D_in=8, H=32.
    N, D_IN, H, L, E = 16, 8, 32, 3, 40

    key = jax.random.PRNGKey(0)
    k_x, k_src, k_dst, k_params = jax.random.split(key, 4)

    x = jax.random.normal(k_x, (N, D_IN), jnp.float32)
    src = jax.random.randint(k_src, (E,), 0, N, jnp.int32)
    dst = jax.random.randint(k_dst, (E,), 0, N, jnp.int32)
    edge_index = jnp.stack([src, dst], axis=0)  # [2, E]

    params = init_params(k_params, D_IN, H, L)

    out = multilayer_gcn_forward(x, edge_index, params)
    out = jax.block_until_ready(out)
    assert out.shape == (N, 1), out.shape

    # bf16 MXU inputs with f32 accumulation -> loose tolerance vs f32 reference.
    ref = multilayer_gcn_reference(x, edge_index, params)
    np.testing.assert_allclose(np.asarray(out), np.asarray(ref),
                               rtol=1e-1, atol=2e-2)
    print("KERNEL_OK")
</pallas_src>

<mosaic_0001>
module attributes {stable_mosaic.version = 11 : i64} {
  func.func @_fused_gcn_kernel(%arg0: memref<16x16xbf16, #tpu.memory_space<vmem>>, %arg1: memref<16x8xbf16, #tpu.memory_space<vmem>>, %arg2: memref<8x32xbf16, #tpu.memory_space<vmem>>, %arg3: memref<1x32xf32, #tpu.memory_space<vmem>>, %arg4: memref<32x32xbf16, #tpu.memory_space<vmem>>, %arg5: memref<1x32xf32, #tpu.memory_space<vmem>>, %arg6: memref<32x128xbf16, #tpu.memory_space<vmem>>, %arg7: memref<1x128xf32, #tpu.memory_space<vmem>>, %arg8: memref<16x128xf32, #tpu.memory_space<vmem>>) attributes {dimension_semantics = [], scalar_prefetch = 0 : i64, scratch_operands = 0 : i64, tpu.core_type = #tpu.core_type<tc>} {
    %c0 = arith.constant 0 : index
    %c0_0 = arith.constant 0 : index
    %0 = vector.load %arg0[%c0, %c0_0] : memref<16x16xbf16, #tpu.memory_space<vmem>>, vector<16x16xbf16>
    %c0_1 = arith.constant 0 : index
    %c0_2 = arith.constant 0 : index
    %1 = vector.load %arg1[%c0_1, %c0_2] : memref<16x8xbf16, #tpu.memory_space<vmem>>, vector<16x8xbf16>
    %c0_3 = arith.constant 0 : index
    %c0_4 = arith.constant 0 : index
    %2 = vector.load %arg2[%c0_3, %c0_4] : memref<8x32xbf16, #tpu.memory_space<vmem>>, vector<8x32xbf16>
    %c0_5 = arith.constant 0 : index
    %c0_6 = arith.constant 0 : index
    %3 = vector.load %arg3[%c0_5, %c0_6] : memref<1x32xf32, #tpu.memory_space<vmem>>, vector<1x32xf32>
    %cst = arith.constant dense<0.000000e+00> : vector<16x8xf32>
    %4 = tpu.matmul %0, %1, %cst {dimension_numbers = #tpu.dot_dimension_numbers<[1], [0], [0], [1], [0, 0, 1, 1], [], []>} : vector<16x16xbf16>, vector<16x8xbf16>, vector<16x8xf32> -> vector<16x8xf32>
    %5 = arith.truncf %4 : vector<16x8xf32> to vector<16x8xbf16>
    %cst_7 = arith.constant dense<0.000000e+00> : vector<16x32xf32>
    %6 = tpu.matmul %5, %2, %cst_7 {dimension_numbers = #tpu.dot_dimension_numbers<[1], [0], [0], [1], [0, 0, 1, 1], [], []>} : vector<16x8xbf16>, vector<8x32xbf16>, vector<16x32xf32> -> vector<16x32xf32>
    %7 = vector.broadcast %3 : vector<1x32xf32> to vector<16x32xf32>
    %8 = arith.addf %6, %7 : vector<16x32xf32>
    %cst_8 = arith.constant 0.000000e+00 : f32
    %9 = vector.broadcast %cst_8 : f32 to vector<16x32xf32>
    %10 = arith.maximumf %8, %9 : vector<16x32xf32>
    %11 = arith.truncf %10 : vector<16x32xf32> to vector<16x32xbf16>
    %c0_9 = arith.constant 0 : index
    %c0_10 = arith.constant 0 : index
    %12 = vector.load %arg4[%c0_9, %c0_10] : memref<32x32xbf16, #tpu.memory_space<vmem>>, vector<32x32xbf16>
    %c0_11 = arith.constant 0 : index
    %c0_12 = arith.constant 0 : index
    %13 = vector.load %arg5[%c0_11, %c0_12] : memref<1x32xf32, #tpu.memory_space<vmem>>, vector<1x32xf32>
    %cst_13 = arith.constant dense<0.000000e+00> : vector<16x32xf32>
    %14 = tpu.matmul %0, %11, %cst_13 {dimension_numbers = #tpu.dot_dimension_numbers<[1], [0], [0], [1], [0, 0, 1, 1], [], []>} : vector<16x16xbf16>, vector<16x32xbf16>, vector<16x32xf32> -> vector<16x32xf32>
    %15 = arith.truncf %14 : vector<16x32xf32> to vector<16x32xbf16>
    %cst_14 = arith.constant dense<0.000000e+00> : vector<16x32xf32>
    %16 = tpu.matmul %15, %12, %cst_14 {dimension_numbers = #tpu.dot_dimension_numbers<[1], [0], [0], [1], [0, 0, 1, 1], [], []>} : vector<16x32xbf16>, vector<32x32xbf16>, vector<16x32xf32> -> vector<16x32xf32>
    %17 = vector.broadcast %13 : vector<1x32xf32> to vector<16x32xf32>
    %18 = arith.addf %16, %17 : vector<16x32xf32>
    %cst_15 = arith.constant 0.000000e+00 : f32
    %19 = vector.broadcast %cst_15 : f32 to vector<16x32xf32>
    %20 = arith.maximumf %18, %19 : vector<16x32xf32>
    %21 = arith.truncf %20 : vector<16x32xf32> to vector<16x32xbf16>
    %c0_16 = arith.constant 0 : index
    %c0_17 = arith.constant 0 : index
    %22 = vector.load %arg6[%c0_16, %c0_17] : memref<32x128xbf16, #tpu.memory_space<vmem>>, vector<32x128xbf16>
    %c0_18 = arith.constant 0 : index
    %c0_19 = arith.constant 0 : index
    %23 = vector.load %arg7[%c0_18, %c0_19] : memref<1x128xf32, #tpu.memory_space<vmem>>, vector<1x128xf32>
    %cst_20 = arith.constant dense<0.000000e+00> : vector<16x128xf32>
    %24 = tpu.matmul %21, %22, %cst_20 {dimension_numbers = #tpu.dot_dimension_numbers<[1], [0], [0], [1], [0, 0, 1, 1], [], []>} : vector<16x32xbf16>, vector<32x128xbf16>, vector<16x128xf32> -> vector<16x128xf32>
    %25 = arith.truncf %24 : vector<16x128xf32> to vector<16x128xbf16>
    %cst_21 = arith.constant dense<0.000000e+00> : vector<16x128xf32>
    %26 = tpu.matmul %0, %25, %cst_21 {dimension_numbers = #tpu.dot_dimension_numbers<[1], [0], [0], [1], [0, 0, 1, 1], [], []>} : vector<16x16xbf16>, vector<16x128xbf16>, vector<16x128xf32> -> vector<16x128xf32>
    %27 = vector.broadcast %23 : vector<1x128xf32> to vector<16x128xf32>
    %28 = arith.addf %26, %27 : vector<16x128xf32>
    %c0_22 = arith.constant 0 : index
    %c0_23 = arith.constant 0 : index
    %29 = vector.load %arg8[%c0_22, %c0_23] : memref<16x128xf32, #tpu.memory_space<vmem>>, vector<16x128xf32>
    tpu.vector_store %arg8[%c0_22, %c0_23], %28 {strides = array<i32>} : memref<16x128xf32, #tpu.memory_space<vmem>>, vector<16x128xf32>,
    return
  }
}

</mosaic_0001>

<bundles_post_ra>
// kernel: tpu_custom_call.1
= control target key start
LH: loop header
LB: loop body
LE: loop exit
PB: predicated region body
PF: predicated region fallthrough
CT: control target
= control target key end

     0   :  { %13 = vsyncpa [#allocation3], 0  ;;  %s706_s0 = inlined_call_operand.hbm [shape: bf16[16,16], index: 0, kind: input, shape index: {}]   ;;  %s707_s1 = inlined_call_operand.vmem [shape: bf16[16,8], index: 1, kind: input, shape index: {}]   ;;  %s708_s2 = inlined_call_operand.hbm [shape: bf16[8,32], index: 2, kind: input, shape index: {}]   ;;  %s709_s3 = inlined_call_operand.vmem [shape: f32[1,32], index: 3, kind: input, shape index: {}]   ;;  %s710_s4 = inlined_call_operand.vmem [shape: bf16[32,32], index: 4, kind: input, shape index: {}]   ;;  %s711_s5 = inlined_call_operand.vmem [shape: f32[1,32], index: 5, kind: input, shape index: {}]   ;;  %s712_s6 = inlined_call_operand.vmem [shape: bf16[32,128], index: 6, kind: input, shape index: {}]   ;;  %s713_s7 = inlined_call_operand.vmem [shape: f32[1,128], index: 7, kind: input, shape index: {}]   ;;  %s714_s8 = inlined_call_operand.hbm [shape: f32[16,128], index: 8, kind: output, shape index: {}]  }
   0x1   :  { %14 = vsyncpa [#allocation6], 0 }
   0x2   :  { %15 = vsyncpa [#allocation4], 0  ;;  %s576_s27 = smov [#allocation2]   ;;  %s504_s9 = scalar_lea.hbm %s706_s0, 128 }
   0x3   :  { %s21_s28 = sshll.u32 %s576_s27, 4  ;;  %p505_p0 = scmp.ne.s32.totalorder %s706_s0, %s504_s9  ;;  %s22_s28 = int_to_ptr.vmem [resolvable:$true] %s21_s28 }
   0x4   :  { %p508_p1 = scmp.lt.u32.totalorder %s504_s9, %s706_s0 }
   0x6   :  { %p510_p2 = pnand %p508_p1, %p505_p0 }
   0x8   :  { %513 = shalt.err (!%p510_p2)
}
   0x9   :  { %s514_s14 = scalar_lea.vmem %s22_s28, 128  ;;  %p519_p4 = scmp.lt.s32.totalorder %s22_s28, %s22_s28 }
   0xa   :  { %p515_p3 = scmp.ne.s32.totalorder %s22_s28, %s514_s14  ;;  %p520_p5 = scmp.lt.s32.totalorder %s514_s14, %s514_s14 }
   0xc   :  { %p521_p6 = por %p520_p5, %p519_p4 }
   0xe   :  { %p522_p7 = pnand %p521_p6, %p515_p3 }
  0x10   :  { %525 = shalt.err (!%p522_p7)
}
  0x11   :  { %s577_s15 = smov 64   ;;  %s578_s16 = smov 4  }
  0x12   :  { %27 = dma.hbm_to_vmem [thread:$0]  %s706_s0, 128, %s22_s28, [#allocation3], %s577_s15, %s577_s15, %s578_s16  }
  0x13   :  { %s579_s19 = smov [#allocation5]   ;;  %s526_s23 = scalar_lea.hbm %s708_s2, 64 }
  0x14   :  { %s36_s20 = sshll.u32 %s579_s19, 4  ;;  %p527_p8 = scmp.ne.s32.totalorder %s708_s2, %s526_s23  ;;  %s37_s20 = int_to_ptr.vmem [resolvable:$true] %s36_s20 }
  0x15   :  { %p530_p9 = scmp.lt.u32.totalorder %s526_s23, %s708_s2 }
  0x17   :  { %p532_p10 = pnand %p530_p9, %p527_p8 }
  0x19   :  { %535 = shalt.err (!%p532_p10)
}
  0x1a   :  { %s536_s29 = scalar_lea.vmem %s37_s20, 64  ;;  %p541_p12 = scmp.lt.s32.totalorder %s37_s20, %s37_s20 }
  0x1b   :  { %p537_p11 = scmp.ne.s32.totalorder %s37_s20, %s536_s29  ;;  %p542_p13 = scmp.lt.s32.totalorder %s536_s29, %s536_s29 }
  0x1d   :  { %p543_p0 = por %p542_p13, %p541_p12 }
  0x1f   :  { %p544_p1 = pnand %p543_p0, %p537_p11 }
  0x21   :  { %547 = shalt.err (!%p544_p1)
}
  0x22   :  { %39 = dma.hbm_to_vmem [thread:$0]  %s708_s2, 64, %s37_s20, [#allocation6]  }
  0x23   :  { %570 = dma.done.wait [#allocation3], 128  }
  0x24   :  { %571 = vsyncadd [#allocation3], 4294967168 }
  0x25   :  { %572 = dma.done.wait [#allocation6], 64  }
  0x26   :  { %573 = vsyncadd [#allocation6], 4294967232  ;;  %v580_v0 = vmov 0.0   ;;  %vm581_vm0 = vmmov 0   ;;  %v498_v1 = vld [vmem:[%s707_s1] sm:$0xff]   ;;  %vm74_vm1 = vcmask 130048  }
  0x27   :  { %449 = vmatprep.subr.bf16.mxu0 %v580_v0  ;;  %451 = vmatprep.mubr.msk.bf16.mxu0 %vm581_vm0, %v580_v0  ;;  %v659_v2 = vld [vmem:[#allocation2] sm:$0xff]   ;;  %v61_v3 = vld [vmem:[#allocation5] sm:$0xf]  ;;  %vm130_vm2 = vcmask 1043456   ;;  %vm126_vm3 = vcmask 64512   ;;  %vm243_vm4 = vcmask 261120  }
  0x28   :  { %455 = vmatprep.subr.bf16.mxu1 %v580_v0  ;;  %457 = vmatprep.mubr.msk.bf16.mxu1 %vm581_vm0, %v580_v0  ;;  %v132_v4 = vsel %vm130_vm2, %v61_v3, 0  ;;  %v500_v10 = vld [vmem:[%s710_s4] sm:$0xff]   ;;  %v501_v21 = vld [vmem:[%s710_s4 + $0x8] sm:$0xff]   ;;  %s582_s18 = smov [#allocation7]  }
  0x29   :  { %450 = vmatpush3.bf16.msra.mxu0 %v498_v1  ;;  %456 = vmatpush3.bf16.msra.mxu1 %v132_v4  ;;  %v423_v11 = vld [vmem:[%s709_s3] ss:$0 sm:$0xff]  ;;  %v503_v28 = vld [vmem:[%s712_s6 + $0x8] sm:$0xff]   ;;  %s407_s19 = sshll.u32 %s582_s18, 4  ;;  %s408_s19 = int_to_ptr.vmem [resolvable:$true] %s407_s19 }
  0x2a   :  { %461 = vmatprep.subr.bf16.mxu0 %v580_v0  ;;  %467 = vmatprep.subr.bf16.mxu1 %v580_v0  ;;  %v502_v27 = vld [vmem:[%s712_s6] sm:$0xff]   ;;  %s548_s20 = scalar_lea.vmem %s408_s19, 256  ;;  %p553_p3 = scmp.lt.s32.totalorder %s408_s19, %s408_s19 }
  0x2b   :  { %v426_v29 = vld [vmem:[%s711_s5] ss:$0 sm:$0xff]  ;;  %p549_p2 = scmp.ne.s32.totalorder %s408_s19, %s548_s20  ;;  %p554_p4 = scmp.lt.s32.totalorder %s548_s20, %s548_s20 }
  0x2c   :  { %452 = vmatmul.mubr.msk.bf16.vlgmr.msra.gmra.mrb[0].mxu0 %vm74_vm1, %v659_v2  ;;  %v433_v44 = vld [vmem:[%s713_s7] ss:$0 sm:$0xff] }
  0x2d   :  { %463 = vmatprep.mubr.msk.bf16.mxu0 %vm581_vm0, %v580_v0  ;;  %p555_p5 = por %p554_p4, %p553_p3 }
  0x2f   :  { %p556_p6 = pnand %p555_p5, %p549_p2 }
  0xff   :  { %v112_v5 = vpop.f32.mrb[0].mxu0 }
 0x100   :  { %v453_v6 = vpop.f32.mrb[1].mxu0 }
 0x101   :  { %v115_v7 = vpop.f32.mrb[2].mxu0 }
 0x102   :  { %v119_v8 = vpack.c.bf16 %v115_v7, %v112_v5  ;;  %v454_v9 = vpop.f32.mrb[3].mxu0 }
 0x104   :  { %458 = vmatmul.mubr.msk.bf16.vlgmr.msra.gmra.mrb[0].mxu1 %vm126_vm3, %v119_v8 }
 0x105   :  { %471 = vmatprep.mubr.msk.bf16.mxu1 %vm581_vm0, %v580_v0  ;;  %468 = vmatpush3.bf16.msra.mxu1 %v500_v10 }
 0x106   :  { %469 = vmatprep.subr.bf16.mxu1 %v580_v0 }
 0x109   :  { %470 = vmatpush3.bf16.msra.mxu1 %v501_v21 }
 0x10a   :  { %483 = vmatprep.subr.bf16.mxu1 %v580_v0 }
 0x1d7   :  { %v168_v12 = vpop.f32.mrb[0].mxu1 }
 0x1d8   :  { %v169_v13 = vadd.f32 %v423_v11, %v168_v12  ;;  %v459_v14 = vpop.f32.mrb[1].mxu1 }
 0x1d9   :  { %v171_v15 = vpop.f32.mrb[2].mxu1 }
 0x1da   :  { %v172_v16 = vadd.f32 %v423_v11, %v171_v15  ;;  %v460_v17 = vpop.f32.mrb[3].mxu1  ;;  %v175_v18 = vmax.f32 %v169_v13, 0.0 }
 0x1dc   :  { %v176_v19 = vmax.f32 %v172_v16, 0.0 }
 0x1de   :  { %v177_v20 = vpack.c.bf16 %v176_v19, %v175_v18 }
 0x1e0   :  { %462 = vmatpush3.bf16.msra.mxu0 %v177_v20 }
 0x1e1   :  { %475 = vmatprep.subr.bf16.mxu0 %v580_v0 }
 0x1e3   :  { %464 = vmatmul.mubr.msk.bf16.vlgmr.msra.gmra.mrb[4].mxu0 %vm74_vm1, %v659_v2 }
 0x1e4   :  { %479 = vmatprep.mubr.msk.bf16.mxu0 %vm581_vm0, %v580_v0  ;;  %476 = vmatpush3.bf16.msra.mxu0 %v502_v27 }
 0x1e5   :  { %477 = vmatprep.subr.bf16.mxu0 %v580_v0 }
 0x1e8   :  { %478 = vmatpush3.bf16.msra.mxu0 %v503_v28 }
 0x2b6   :  { %v217_v22 = vpop.f32.mrb[4].mxu0 }
 0x2b7   :  { %v465_v23 = vpop.f32.mrb[5].mxu0 }
 0x2b8   :  { %v220_v24 = vpop.f32.mrb[6].mxu0 }
 0x2b9   :  { %v224_v25 = vpack.c.bf16 %v220_v24, %v217_v22  ;;  %v466_v26 = vpop.f32.mrb[7].mxu0 }
 0x2bb   :  { %472 = vmatmul.mubr.msk.bf16.vlgmr.msra.gmra.mrb[4].mxu1 %vm243_vm4, %v224_v25 }
 0x2bc   :  { %485 = vmatprep.mubr.msk.bf16.mxu1 %vm581_vm0, %v580_v0 }
 0x38e   :  { %v281_v30 = vpop.f32.mrb[4].mxu1 }
 0x38f   :  { %v282_v31 = vadd.f32 %v426_v29, %v281_v30  ;;  %v473_v32 = vpop.f32.mrb[5].mxu1 }
 0x390   :  { %v284_v33 = vpop.f32.mrb[6].mxu1 }
 0x391   :  { %v285_v34 = vadd.f32 %v426_v29, %v284_v33  ;;  %v474_v35 = vpop.f32.mrb[7].mxu1  ;;  %v288_v36 = vmax.f32 %v282_v31, 0.0 }
 0x393   :  { %v289_v37 = vmax.f32 %v285_v34, 0.0 }
 0x395   :  { %v290_v38 = vpack.c.bf16 %v289_v37, %v288_v36 }
 0x397   :  { %480 = vmatmul.mubr.msk.bf16.vlgmr.msra.gmra.mrb[8].mxu0 %vm243_vm4, %v290_v38 }
 0x46a   :  { %v345_v39 = vpop.f32.mrb[8].mxu0 }
 0x46b   :  { %v481_v40 = vpop.f32.mrb[9].mxu0 }
 0x46c   :  { %v348_v41 = vpop.f32.mrb[10].mxu0 }
 0x46d   :  { %v352_v42 = vpack.c.bf16 %v348_v41, %v345_v39  ;;  %v482_v43 = vpop.f32.mrb[11].mxu0 }
 0x46f   :  { %484 = vmatpush3.bf16.msra.mxu1 %v352_v42 }
 0x472   :  { %486 = vmatmul.mubr.msk.bf16.vlgmr.msra.gmra.mrb[8].mxu1 %vm74_vm1, %v659_v2 }
 0x545   :  { %v393_v45 = vpop.f32.mrb[8].mxu1 }
 0x546   :  { %v394_v46 = vadd.f32 %v433_v44, %v393_v45  ;;  %v487_v47 = vpop.f32.mrb[9].mxu1 }
 0x547   :  { %v396_v48 = vpop.f32.mrb[10].mxu1 }
 0x548   :  { %400 = vst [vmem:[#allocation7] sm:$0xff] %v394_v46  ;;  %v397_v49 = vadd.f32 %v433_v44, %v396_v48  ;;  %v488_v50 = vpop.f32.mrb[11].mxu1 }
 0x54a   :  { %401 = vst [vmem:[#allocation7 + $0x8] sm:$0xff] %v397_v49 }
 0x54b   :  { %559 = shalt.err (!%p556_p6)
}
 0x54c   :  { %s560_s22 = scalar_lea.hbm %s714_s8, 256 }
 0x54d   :  { %p561_p7 = scmp.ne.s32.totalorder %s714_s8, %s560_s22  ;;  %p564_p8 = scmp.lt.u32.totalorder %s560_s22, %s714_s8 }
 0x54f   :  { %p566_p9 = pnand %p564_p8, %p561_p7 }
 0x551   :  { %569 = shalt.err (!%p566_p9)
}
 0x552   :  { %s583_s27 = smov 128   ;;  %s584_s29 = smov 8  }
 0x553   :  { %413 = dma.vmem_to_hbm [thread:$0]  %s408_s19, 256, %s714_s8, [#allocation4], %s583_s27, %s583_s27, %s584_s29  }
 0x554   :  { %574 = dma.done.wait [#allocation4], 256  }
 0x555   :  { %575 = vsyncadd [#allocation4], 4294967040 }
 0x556   :  { %417 = vsyncpa [#allocation3], 1 }
 0x557   :  { %418 = vsyncpa [#allocation6], 1 }
 0x558   :  { %419 = vsyncpa [#allocation4], 1 }

</bundles_post_ra>
